<compile_context>
chip_gen: v7x
topology: tpu7x:2x2x1
jax: 0.10.0
libtpu: 0.0.40
codegen_flags: <defaults>
</compile_context>

<pallas_src>
import jax
import jax.numpy as jnp
from jax.experimental import pallas as pl
from jax.experimental.pallas import tpu as pltpu


def _round_up(x, m):
    return ((x + m - 1) // m) * m


# --------------------- Stage 1: Linear1 + ReLU + LayerNorm -------------------

def _hidden_kernel(x_ref, w1_ref, b1_ref, g_ref, beta_ref, h_ref):
    # x_ref : (TM, D) bf16, w1_ref: (D, H) bf16, b1/g/beta: (1, H) f32
    # h_ref : (TM, H) bf16
    h = jnp.dot(x_ref[...], w1_ref[...], preferred_element_type=jnp.float32)
    h = jnp.maximum(h + b1_ref[...], 0.0)
    # LayerNorm over hidden dim, f32 stats (torch eps = 1e-5, biased var).
    mean = jnp.mean(h, axis=-1, keepdims=True)
    var = jnp.mean((h - mean) * (h - mean), axis=-1, keepdims=True)
    h = (h - mean) * jax.lax.rsqrt(var + 1e-5)
    h = h * g_ref[...] + beta_ref[...]
    h_ref[...] = h.astype(h_ref.dtype)


def _hidden_pallas(x_bf16, w1_b, b1_f, g_f, beta_f, *, tile_m):
    M_pad, D = x_bf16.shape
    H = w1_b.shape[1]
    return pl.pallas_call(
        _hidden_kernel,
        out_shape=jax.ShapeDtypeStruct((M_pad, H), jnp.bfloat16),
        grid_spec=pltpu.PrefetchScalarGridSpec(
            num_scalar_prefetch=0,
            grid=(M_pad // tile_m,),
            in_specs=[
                pl.BlockSpec((tile_m, D), lambda i: (i, 0)),   # x
                pl.BlockSpec((D, H), lambda i: (0, 0)),        # w1 (invariant)
                pl.BlockSpec((1, H), lambda i: (0, 0)),        # b1
                pl.BlockSpec((1, H), lambda i: (0, 0)),        # gamma
                pl.BlockSpec((1, H), lambda i: (0, 0)),        # beta
            ],
            out_specs=pl.BlockSpec((tile_m, H), lambda i: (i, 0)),
        ),
        compiler_params=pltpu.CompilerParams(
            dimension_semantics=("parallel",)),
    )(x_bf16, w1_b, b1_f, g_f, beta_f)


# --------------------------- Stage 2: h @ W2 + b2 ----------------------------

def _logits_kernel(h_ref, w2_ref, b2_ref, o_ref):
    # h_ref: (TM, H) bf16, w2_ref: (H, TV) bf16, b2_ref: (1, TV) f32
    out = jnp.dot(h_ref[...], w2_ref[...], preferred_element_type=jnp.float32)
    o_ref[...] = (out + b2_ref[...]).astype(o_ref.dtype)


def _logits_pallas(h, w2_b, b2_f, *, tile_m, tile_v, out_dtype):
    M_pad, H = h.shape
    V_pad = w2_b.shape[1]
    nm = M_pad // tile_m
    nv = V_pad // tile_v
    out_itemsize = jnp.dtype(out_dtype).itemsize

    # Explicit VMEM budget (double-buffered tiles) -> safe on v7x's 64 MiB.
    needed = (2 * H * tile_v * 2            # w2 tile (bf16)
              + 2 * tile_v * 4              # b2 tile (f32)
              + 2 * tile_m * H * 2          # h tile  (bf16)
              + 2 * tile_m * tile_v * out_itemsize)   # out tile
    vmem_limit = int(needed * 1.5) + (8 << 20)

    cost = pl.CostEstimate(
        flops=2 * M_pad * H * V_pad,
        transcendentals=0,
        bytes_accessed=(H * V_pad * 2               # W2 streamed exactly once
                        + nv * M_pad * H * 2        # h re-read per V tile
                        + M_pad * V_pad * out_itemsize
                        + V_pad * 4),
    )

    return pl.pallas_call(
        _logits_kernel,
        out_shape=jax.ShapeDtypeStruct((M_pad, V_pad), out_dtype),
        grid_spec=pltpu.PrefetchScalarGridSpec(
            num_scalar_prefetch=0,
            # V on the OUTER axis: the w2/b2 block index only changes when the
            # outer axis advances, so each W2 tile is fetched from HBM once.
            grid=(nv, nm),
            in_specs=[
                pl.BlockSpec((tile_m, H), lambda j, i: (i, 0)),   # h (small)
                pl.BlockSpec((H, tile_v), lambda j, i: (0, j)),   # w2 streamed once
                pl.BlockSpec((1, tile_v), lambda j, i: (0, j)),   # b2
            ],
            out_specs=pl.BlockSpec((tile_m, tile_v), lambda j, i: (i, j)),
        ),
        compiler_params=pltpu.CompilerParams(
            # Outer (V) axis parallel -> both v7x TensorCores get work even
            # when M fits in a single tile; each core streams its half of W2.
            dimension_semantics=("parallel", "arbitrary"),
            vmem_limit_bytes=vmem_limit,
        ),
        cost_estimate=cost,
    )(h, w2_b, b2_f)


# ------------------------------ Parameter prep -------------------------------

def init_params(key, num_inputs, num_hiddens, vocab_size):
    k1, k2, k3, k4 = jax.random.split(key, 4)
    # Linear weights stored as (in, out).
    w1 = jax.random.normal(k1, (num_inputs, num_hiddens), jnp.float32) * 0.02
    b1 = jax.random.normal(k2, (1, num_hiddens), jnp.float32) * 0.01
    gamma = jnp.ones((1, num_hiddens), jnp.float32)
    beta = jnp.zeros((1, num_hiddens), jnp.float32)
    w2 = jax.random.normal(k3, (num_hiddens, vocab_size), jnp.float32) * 0.02
    b2 = jax.random.normal(k4, (1, vocab_size), jnp.float32) * 0.01
    return dict(w1=w1, b1=b1, gamma=gamma, beta=beta, w2=w2, b2=b2)


def prepare_params(params, *, tile_v=1024):
    """One-time cast/pad of the weights (NOT in the per-call path)."""
    V = params["w2"].shape[1]
    tile_v = min(tile_v, _round_up(V, 128))
    assert tile_v % 128 == 0
    V_pad = _round_up(V, tile_v)

    w2 = params["w2"]
    b2 = params["b2"].reshape(1, -1)
    if V_pad != V:
        w2 = jnp.pad(w2, ((0, 0), (0, V_pad - V)))
        b2 = jnp.pad(b2, ((0, 0), (0, V_pad - V)))

    return dict(
        w1=params["w1"].astype(jnp.bfloat16),
        b1=params["b1"].reshape(1, -1).astype(jnp.float32),
        gamma=params["gamma"].reshape(1, -1).astype(jnp.float32),
        beta=params["beta"].reshape(1, -1).astype(jnp.float32),
        w2=w2.astype(jnp.bfloat16),
        b2=b2.astype(jnp.float32),
        vocab_size=V,
        tile_v=tile_v,
    )


# --------------------------------- Forward -----------------------------------

def masklm_forward(X, pred_positions, prepared, *, tile_m=256,
                   out_dtype=jnp.float32):
    """MaskLM forward.

    X: (batch, seq_len, num_inputs); pred_positions: (batch, num_pred) int32.
    Returns (batch, num_pred, vocab_size) logits.
    """
    B, _, D = X.shape
    P = pred_positions.shape[1]
    M = B * P
    V = prepared["vocab_size"]
    tile_v = prepared["tile_v"]

    # Position gather kept as plain-JAX glue (mirrors PyTorch advanced
    # indexing); cast to bf16 in the same step so the kernel reads half bytes.
    # TODO(synk): fold this row gather into stage 1 via scalar prefetch +
    # pl.Element row indexing to avoid the masked_X HBM round trip.
    flat_pos = pred_positions.reshape(-1)
    batch_idx = jnp.repeat(jnp.arange(B), P)
    masked_X = X[batch_idx, flat_pos].astype(jnp.bfloat16)      # (M, D)

    # Sublane-aligned M tile; pad M only if needed.
    tile_m = min(tile_m, _round_up(M, 8))
    assert tile_m % 8 == 0
    M_pad = _round_up(M, tile_m)
    if M_pad != M:
        masked_X = jnp.pad(masked_X, ((0, M_pad - M), (0, 0)))

    h = _hidden_pallas(masked_X, prepared["w1"], prepared["b1"],
                       prepared["gamma"], prepared["beta"], tile_m=tile_m)
    logits = _logits_pallas(h, prepared["w2"], prepared["b2"],
                            tile_m=tile_m, tile_v=tile_v, out_dtype=out_dtype)

    # Slice only when padding was actually introduced.
    if M_pad != M or logits.shape[1] != V:
        logits = logits[:M, :V]
    return logits.reshape(B, P, V)


# -------------------------------- Reference ----------------------------------

def _reference(X, pred_positions, p):
    """Pure-JAX reference following the same bf16-matmul / f32-LN path."""
    B, P = pred_positions.shape
    flat_pos = pred_positions.reshape(-1)
    batch_idx = jnp.repeat(jnp.arange(B), P)
    mx = X[batch_idx, flat_pos].astype(jnp.bfloat16)
    h = jnp.dot(mx, p["w1"].astype(jnp.bfloat16),
                preferred_element_type=jnp.float32)
    h = jnp.maximum(h + p["b1"], 0.0)
    mean = h.mean(-1, keepdims=True)
    var = ((h - mean) ** 2).mean(-1, keepdims=True)
    h = (h - mean) * jax.lax.rsqrt(var + 1e-5) * p["gamma"] + p["beta"]
    h = h.astype(jnp.bfloat16)
    out = jnp.dot(h, p["w2"].astype(jnp.bfloat16),
                  preferred_element_type=jnp.float32) + p["b2"]
    return out.reshape(B, P, -1)


if __name__ == "__main__":
    # Small shapes consistent with the module's forward pass.
    batch = 2
    seq_len = 8
    num_inputs = 64     # stands in for the module's default 786
    num_hiddens = 32
    vocab_size = 128
    num_pred = 4

    key = jax.random.PRNGKey(0)
    kx, kp, kw = jax.random.split(key, 3)

    X = jax.random.normal(kx, (batch, seq_len, num_inputs), jnp.float32)
    pred_positions = jax.random.randint(kp, (batch, num_pred), 0, seq_len,
                                        dtype=jnp.int32)
    params = init_params(kw, num_inputs, num_hiddens, vocab_size)
    prepared = prepare_params(params)       # one-time cast/pad

    out = masklm_forward(X, pred_positions, prepared)
    out = jax.block_until_ready(out)

    ref = _reference(X, pred_positions, params)
    assert out.shape == (batch, num_pred, vocab_size)
    assert jnp.allclose(out, ref, atol=2e-3, rtol=2e-3), (
        float(jnp.max(jnp.abs(out - ref))))

    print("KERNEL_OK")
</pallas_src>

<mosaic_0001>
module attributes {stable_mosaic.version = 11 : i64} {
  func.func @_hidden_kernel(%arg0: i32, %arg1: memref<8x64xbf16, #tpu.memory_space<vmem>>, %arg2: memref<64x32xbf16, #tpu.memory_space<vmem>>, %arg3: memref<1x32xf32, #tpu.memory_space<vmem>>, %arg4: memref<1x32xf32, #tpu.memory_space<vmem>>, %arg5: memref<1x32xf32, #tpu.memory_space<vmem>>, %arg6: memref<8x32xbf16, #tpu.memory_space<vmem>>) attributes {dimension_semantics = [#tpu.dimension_semantics<parallel>], iteration_bounds = array<i64: 1>, scalar_prefetch = 0 : i64, scratch_operands = 0 : i64, tpu.core_type = #tpu.core_type<tc>, window_params = [{transform_indices = @transform_0, window_bounds = array<i64: 8, 64>}, {pipeline_mode = #tpu.pipeline_mode<synchronous>, transform_indices = @transform_1, window_bounds = array<i64: 64, 32>}, {pipeline_mode = #tpu.pipeline_mode<synchronous>, transform_indices = @transform_2, window_bounds = array<i64: 1, 32>}, {pipeline_mode = #tpu.pipeline_mode<synchronous>, transform_indices = @transform_3, window_bounds = array<i64: 1, 32>}, {pipeline_mode = #tpu.pipeline_mode<synchronous>, transform_indices = @transform_4, window_bounds = array<i64: 1, 32>}, {transform_indices = @transform_5, window_bounds = array<i64: 8, 32>}]} {
    %c0 = arith.constant 0 : index
    %c0_0 = arith.constant 0 : index
    %0 = vector.load %arg1[%c0, %c0_0] : memref<8x64xbf16, #tpu.memory_space<vmem>>, vector<8x64xbf16>
    %c0_1 = arith.constant 0 : index
    %c0_2 = arith.constant 0 : index
    %1 = vector.load %arg2[%c0_1, %c0_2] : memref<64x32xbf16, #tpu.memory_space<vmem>>, vector<64x32xbf16>
    %cst = arith.constant dense<0.000000e+00> : vector<8x32xf32>
    %2 = tpu.matmul %0, %1, %cst {dimension_numbers = #tpu.dot_dimension_numbers<[1], [0], [0], [1], [0, 0, 1, 1], [], []>} : vector<8x64xbf16>, vector<64x32xbf16>, vector<8x32xf32> -> vector<8x32xf32>
    %c0_3 = arith.constant 0 : index
    %c0_4 = arith.constant 0 : index
    %3 = vector.load %arg3[%c0_3, %c0_4] : memref<1x32xf32, #tpu.memory_space<vmem>>, vector<1x32xf32>
    %4 = vector.broadcast %3 : vector<1x32xf32> to vector<8x32xf32>
    %5 = arith.addf %2, %4 : vector<8x32xf32>
    %cst_5 = arith.constant 0.000000e+00 : f32
    %6 = vector.broadcast %cst_5 : f32 to vector<8x32xf32>
    %7 = arith.maximumf %5, %6 : vector<8x32xf32>
    %cst_6 = arith.constant dense<0.000000e+00> : vector<8xf32>
    %8 = vector.multi_reduction <add>, %7, %cst_6 [1] : vector<8x32xf32> to vector<8xf32>
    %9 = vector.shape_cast %8 : vector<8xf32> to vector<8x1xf32>
    %cst_7 = arith.constant 3.200000e+01 : f32
    %10 = vector.broadcast %cst_7 : f32 to vector<8x1xf32>
    %11 = arith.divf %9, %10 : vector<8x1xf32>
    %12 = vector.broadcast %11 : vector<8x1xf32> to vector<8x32xf32>
    %13 = arith.subf %7, %12 : vector<8x32xf32>
    %14 = vector.broadcast %11 : vector<8x1xf32> to vector<8x32xf32>
    %15 = arith.subf %7, %14 : vector<8x32xf32>
    %16 = arith.mulf %13, %15 : vector<8x32xf32>
    %cst_8 = arith.constant dense<0.000000e+00> : vector<8xf32>
    %17 = vector.multi_reduction <add>, %16, %cst_8 [1] : vector<8x32xf32> to vector<8xf32>
    %18 = vector.shape_cast %17 : vector<8xf32> to vector<8x1xf32>
    %cst_9 = arith.constant 3.200000e+01 : f32
    %19 = vector.broadcast %cst_9 : f32 to vector<8x1xf32>
    %20 = arith.divf %18, %19 : vector<8x1xf32>
    %21 = vector.broadcast %11 : vector<8x1xf32> to vector<8x32xf32>
    %22 = arith.subf %7, %21 : vector<8x32xf32>
    %cst_10 = arith.constant 9.99999974E-6 : f32
    %23 = vector.broadcast %cst_10 : f32 to vector<8x1xf32>
    %24 = arith.addf %20, %23 : vector<8x1xf32>
    %25 = math.rsqrt %24 : vector<8x1xf32>
    %26 = vector.broadcast %25 : vector<8x1xf32> to vector<8x32xf32>
    %27 = arith.mulf %22, %26 : vector<8x32xf32>
    %c0_11 = arith.constant 0 : index
    %c0_12 = arith.constant 0 : index
    %28 = vector.load %arg4[%c0_11, %c0_12] : memref<1x32xf32, #tpu.memory_space<vmem>>, vector<1x32xf32>
    %29 = vector.broadcast %28 : vector<1x32xf32> to vector<8x32xf32>
    %30 = arith.mulf %27, %29 : vector<8x32xf32>
    %c0_13 = arith.constant 0 : index
    %c0_14 = arith.constant 0 : index
    %31 = vector.load %arg5[%c0_13, %c0_14] : memref<1x32xf32, #tpu.memory_space<vmem>>, vector<1x32xf32>
    %32 = vector.broadcast %31 : vector<1x32xf32> to vector<8x32xf32>
    %33 = arith.addf %30, %32 : vector<8x32xf32>
    %34 = arith.truncf %33 : vector<8x32xf32> to vector<8x32xbf16>
    %c0_15 = arith.constant 0 : index
    %c0_16 = arith.constant 0 : index
    %35 = vector.load %arg6[%c0_15, %c0_16] : memref<8x32xbf16, #tpu.memory_space<vmem>>, vector<8x32xbf16>
    tpu.vector_store %arg6[%c0_15, %c0_16], %34 {strides = array<i32>} : memref<8x32xbf16, #tpu.memory_space<vmem>>, vector<8x32xbf16>,
    return
  }
  func.func @transform_0(%arg0: i32) -> (i32, i32) {
    %c0_i32 = arith.constant 0 : i32
    %c0_i32_0 = arith.constant 0 : i32
    return %arg0, %c0_i32 : i32, i32
  }
  func.func @transform_1(%arg0: i32) -> (i32, i32) {
    %c0_i32 = arith.constant 0 : i32
    %c0_i32_0 = arith.constant 0 : i32
    %c0_i32_1 = arith.constant 0 : i32
    return %c0_i32, %c0_i32_0 : i32, i32
  }
  func.func @transform_2(%arg0: i32) -> (i32, i32) {
    %c0_i32 = arith.constant 0 : i32
    %c0_i32_0 = arith.constant 0 : i32
    %c0_i32_1 = arith.constant 0 : i32
    return %c0_i32, %c0_i32_0 : i32, i32
  }
  func.func @transform_3(%arg0: i32) -> (i32, i32) {
    %c0_i32 = arith.constant 0 : i32
    %c0_i32_0 = arith.constant 0 : i32
    %c0_i32_1 = arith.constant 0 : i32
    return %c0_i32, %c0_i32_0 : i32, i32
  }
  func.func @transform_4(%arg0: i32) -> (i32, i32) {
    %c0_i32 = arith.constant 0 : i32
    %c0_i32_0 = arith.constant 0 : i32
    %c0_i32_1 = arith.constant 0 : i32
    return %c0_i32, %c0_i32_0 : i32, i32
  }
  func.func @transform_5(%arg0: i32) -> (i32, i32) {
    %c0_i32 = arith.constant 0 : i32
    %c0_i32_0 = arith.constant 0 : i32
    return %arg0, %c0_i32 : i32, i32
  }
}

</mosaic_0001>

<bundles_post_ra>
// kernel: tpu_custom_call.1
= control target key start
LH: loop header
LB: loop body
LE: loop exit
PB: predicated region body
PF: predicated region fallthrough
CT: control target
= control target key end

     0   :  { %v213_v1 = vmov 0.0   ;;  %vm214_vm0 = vmmov 0   ;;  %s282_s0 = inlined_call_operand.vmem [shape: bf16[8,64], index: 0, kind: input, shape index: {}]   ;;  %s283_s1 = inlined_call_operand.vmem [shape: bf16[64,32], index: 1, kind: input, shape index: {}]   ;;  %s284_s2 = inlined_call_operand.vmem [shape: f32[1,32], index: 2, kind: input, shape index: {}]   ;;  %s285_s3 = inlined_call_operand.vmem [shape: f32[1,32], index: 3, kind: input, shape index: {}]   ;;  %s286_s4 = inlined_call_operand.vmem [shape: f32[1,32], index: 4, kind: input, shape index: {}]   ;;  %s287_s5 = inlined_call_operand.hbm [shape: bf16[8,32], index: 5, kind: output, shape index: {}]  }
   0x1   :  { %v183_v0 = vld [vmem:[%s283_s1] sm:$0xff]   ;;  %168 = vmatprep.subr.bf16.mxu0 %v213_v1  ;;  %v184_v2 = vld [vmem:[%s283_s1 + $0x8] sm:$0xff]   ;;  %176 = vmatprep.mubr.msk.bf16.mxu0 %vm214_vm0, %v213_v1 }
   0x2   :  { %169 = vmatpush3.bf16.msra.mxu0 %v183_v0 }
   0x3   :  { %170 = vmatprep.subr.bf16.mxu0 %v213_v1 }
   0x4   :  { %10 = vsyncpa [#allocation3], 0  ;;  %v185_v3 = vld [vmem:[%s283_s1 + $0x10] sm:$0xff]   ;;  %v186_v4 = vld [vmem:[%s283_s1 + $0x18] sm:$0xff]   ;;  %vm62_vm1 = vcmask 523264   ;;  %vm107_vm2 = vcmask 261120  }
   0x5   :  { %v22_v5 = vld [vmem:[%s282_s0] sm:$0xf]  ;;  %s215_s6 = smov [#allocation2]   ;;  %vm139_vm3 = vcmask 257024  }
   0x6   :  { %171 = vmatpush3.bf16.msra.mxu0 %v184_v2  ;;  %v155_v6 = vld [vmem:[%s284_s2] ss:$0 sm:$0xff]  ;;  %s147_s7 = sshll.u32 %s215_s6, 4  ;;  %s148_s7 = int_to_ptr.vmem [resolvable:$true] %s147_s7 }
   0x7   :  { %172 = vmatprep.subr.bf16.mxu0 %v213_v1  ;;  %v161_v23 = vld [vmem:[%s285_s3] ss:$0 sm:$0xff]  ;;  %s189_s8 = scalar_lea.vmem %s148_s7, 64  ;;  %p194_p1 = scmp.lt.s32.totalorder %s148_s7, %s148_s7 }
   0x8   :  { %v162_v25 = vld [vmem:[%s286_s4] ss:$0 sm:$0xff]  ;;  %p190_p0 = scmp.ne.s32.totalorder %s148_s7, %s189_s8  ;;  %p195_p2 = scmp.lt.s32.totalorder %s189_s8, %s189_s8 }
   0xa   :  { %173 = vmatpush3.bf16.msra.mxu0 %v185_v3  ;;  %p196_p3 = por %p195_p2, %p194_p1 }
   0xb   :  { %174 = vmatprep.subr.bf16.mxu0 %v213_v1 }
   0xc   :  { %p197_p4 = pnand %p196_p3, %p190_p0 }
   0xe   :  { %175 = vmatpush3.bf16.msra.mxu0 %v186_v4 }
  0x11   :  { %177 = vmatmul.mubr.msk.bf16.vlgmr.msra.gmra.mrb[0].mxu0 %vm62_vm1, %v22_v5 }
  0xe4   :  { %v100_v7 = vpop.f32.mrb[0].mxu0 }
  0xe5   :  { %v101_v8 = vadd.f32 %v155_v6, %v100_v7  ;;  %v178_v9 = vpop.f32.mrb[1].mxu0 }
  0xe6   :  { %v103_v10 = vpop.f32.mrb[2].mxu0 }
  0xe7   :  { %v106_v11 = vmax.f32 %v101_v8, 0.0  ;;  %v179_v12 = vpop.f32.mrb[3].mxu0 }
  0xe9   :  { %v108_v13 = vsel %vm107_vm2, %v106_v11, 0.0 }
  0xea   :  { %109 = vadd.xlane.f32.xlu0 %v108_v13 }
 0x177   :  { %v110_v14 = vpop.xlane.xlu0 %109 }
 0x178   :  { %v112_v15 = vmul.f32 0.03125, %v110_v14 }
 0x17a   :  { %v113_v16 = vsub.f32 %v106_v11, %v112_v15 }
 0x17c   :  { %v114_v17 = vmul.f32 %v113_v16, %v113_v16 }
 0x17e   :  { %v115_v18 = vsel %vm107_vm2, %v114_v17, 0.0 }
 0x17f   :  { %116 = vadd.xlane.f32.xlu0 %v115_v18 }
 0x20c   :  { %v117_v19 = vpop.xlane.xlu0 %116 }
 0x20d   :  { %v118_v20 = vmul.f32 0.03125, %v117_v19 }
 0x20f   :  { %v119_v21 = vadd.f32 1e-05, %v118_v20 }
 0x211   :  { %187 = vrsqrt.f32 %v119_v21 }
 0x21b   :  { %v188_v22 = vpop.eup %187 }
 0x21c   :  { %v121_v24 = vmul.f32 %v188_v22, %v113_v16 }
 0x21e   :  { %v129_v26 = vmul.f32 %v161_v23, %v121_v24 }
 0x220   :  { %v137_v27 = vadd.f32 %v162_v25, %v129_v26 }
 0x222   :  { %v138_v28 = vpack.c.bf16 %v137_v27, %v137_v27 }
 0x224   :  { %140 = vst.msk [vmem:[#allocation2] sm:$0xf] %vm139_vm3, %v138_v28 }
 0x225   :  { %200 = shalt.err (!%p197_p4)
}
 0x226   :  { %s201_s10 = scalar_lea.hbm %s287_s5, 64 }
 0x227   :  { %p202_p5 = scmp.ne.s32.totalorder %s287_s5, %s201_s10  ;;  %p205_p6 = scmp.lt.u32.totalorder %s201_s10, %s287_s5 }
 0x229   :  { %p207_p7 = pnand %p205_p6, %p202_p5 }
 0x22b   :  { %210 = shalt.err (!%p207_p7)
}
 0x22c   :  { %150 = dma.vmem_to_hbm [thread:$0]  %s148_s7, 64, %s287_s5, [#allocation3]  }
 0x22d   :  { %211 = dma.done.wait [#allocation3], 64  }
 0x22e   :  { %212 = vsyncadd [#allocation3], 4294967232 }
 0x22f   :  { %154 = vsyncpa [#allocation3], 1 }

</bundles_post_ra>
